<compile_context>
chip_gen: v7x
topology: tpu7x:2x2x1
jax: 0.10.0
libtpu: 0.0.40
codegen_flags: <defaults>
</compile_context>

<pallas_src>
from functools import partial

import jax
import jax.numpy as jnp
from jax.experimental import pallas as pl
from jax.experimental.pallas import tpu as pltpu


def _self_attn_pooling_kernel(x_ref, bias_ref, gamma_ref, beta_ref,
                              w_ref, b_ref, wo_ref, bo_ref, o_ref,
                              *, n_heads, d_v, tb, t):
    H = n_heads
    hdv = H * d_v
    r = tb * t                                              # rows in flat view

    # ---- LayerNorm(d_model, eps=1e-6) over the flattened [TB*T, D] slab ----
    x = x_ref[...].astype(jnp.float32).reshape(r, -1)       # [R, D]
    mu = jnp.mean(x, axis=-1, keepdims=True)
    xc = x - mu
    var = jnp.mean(xc * xc, axis=-1, keepdims=True)
    key = xc * jax.lax.rsqrt(var + 1e-6)
    key = key * gamma_ref[...] + beta_ref[...]              # [R, D]

    # ---- fused score/value projection: one [R,D] @ [D,H+H*d_v] MXU matmul --
    proj = jnp.dot(key, w_ref[...],
                   preferred_element_type=jnp.float32) + b_ref[...]  # [R, H+Hdv]
    scores = proj[:, :H]                                    # [R, H]
    values = proj[:, H:]                                    # [R, Hdv]

    # ---- softmax over tokens (bias pre-reduced/transposed to [TB, T, H]) ----
    s = scores.reshape(tb, t, H) + bias_ref[...].astype(jnp.float32)
    s = s - jnp.max(s, axis=1, keepdims=True)
    e = jnp.exp(s)
    attn = (e / jnp.sum(e, axis=1, keepdims=True)).reshape(r, H)   # [R, H]
    # attention dropout = identity (inference)

    # ---- context[b, h*d_v+j] = sum_t attn[b,t,h] * values[b,t,h*d_v+j] ----
    # Expand attn across each head's d_v value lanes with a tiny constant 0/1
    # matrix (MXU, stays lane-dense; no per-head loop / concat / transpose),
    # Hadamard with values, then reduce the T tokens of each block with a
    # sublane-axis sum (XLU) on the free reshape (tb, t, hdv).
    hr = jax.lax.broadcasted_iota(jnp.int32, (H, hdv), 0)
    hc = jax.lax.broadcasted_iota(jnp.int32, (H, hdv), 1)
    expand = jnp.where((hc >= hr * d_v) & (hc < (hr + 1) * d_v),
                       1.0, 0.0).astype(jnp.float32)        # [H, Hdv]
    attn_e = jnp.dot(attn, expand,
                     preferred_element_type=jnp.float32)    # [R, Hdv]

    ctx = jnp.sum((attn_e * values).reshape(tb, t, hdv), axis=1)   # [TB, Hdv]

    # ---- output projection ----
    out = jnp.dot(ctx, wo_ref[...],
                  preferred_element_type=jnp.float32) + bo_ref[...]   # [TB, D]
    o_ref[...] = out.astype(o_ref.dtype)                    # output dropout = identity


def _pick_tb(bn, want):
    """Largest divisor of bn <= want that is a multiple of 8 (or == bn)."""
    if bn <= want:
        return bn
    for tb in range(min(want, bn), 0, -1):
        if bn % tb == 0 and (tb % 8 == 0 or tb == bn):
            return tb
    for tb in range(min(want, bn), 0, -1):
        if bn % tb == 0:
            return tb
    return 1


def self_attention_pooling(enc_input, bias, params, *, n_heads, d_v, n_blocks,
                           block_rows=32):
    BN, T, D = enc_input.shape
    H = n_heads
    hdv = H * d_v
    tb = _pick_tb(BN, block_rows)
    grid = (BN // tb,)

    # Reduce the [BN,H,T,T] additive mask over the query axis (query index 0 —
    # a padding mask is constant over queries) and pre-transpose to [BN, T, H]
    # so the kernel needs no transpose and DMAs T x fewer bias bytes.
    bias_red = jnp.transpose(bias[:, :, 0, :], (0, 2, 1))   # [BN, T, H]

    # Fuse score/value projections into a single matmul.
    w_fused = jnp.concatenate([params["wk"], params["wv"]], axis=1)   # [D, H+Hdv]
    b_fused = jnp.concatenate([params["bk"], params["bv"]], axis=1)   # [1, H+Hdv]

    kernel = partial(_self_attn_pooling_kernel,
                     n_heads=H, d_v=d_v, tb=tb, t=T)

    out = pl.pallas_call(
        kernel,
        out_shape=jax.ShapeDtypeStruct((BN, D), enc_input.dtype),
        grid_spec=pltpu.PrefetchScalarGridSpec(
            num_scalar_prefetch=0,
            grid=grid,
            in_specs=[
                pl.BlockSpec((tb, T, D), lambda i: (i, 0, 0)),     # enc_input
                pl.BlockSpec((tb, T, H), lambda i: (i, 0, 0)),     # reduced bias
                pl.BlockSpec((1, D), lambda i: (0, 0)),            # ln gamma
                pl.BlockSpec((1, D), lambda i: (0, 0)),            # ln beta
                pl.BlockSpec((D, H + hdv), lambda i: (0, 0)),      # fused W
                pl.BlockSpec((1, H + hdv), lambda i: (0, 0)),      # fused b
                pl.BlockSpec((hdv, D), lambda i: (0, 0)),          # Wo
                pl.BlockSpec((1, D), lambda i: (0, 0)),            # bo
            ],
            out_specs=pl.BlockSpec((tb, D), lambda i: (i, 0)),
        ),
        compiler_params=pltpu.CompilerParams(
            dimension_semantics=("parallel",)),
    )(enc_input, bias_red, params["ln_gamma"], params["ln_beta"],
      w_fused, b_fused, params["wo"], params["bo"])

    # view(-1, n_blocks, d_model); output dropout = identity (inference)
    return out.reshape(-1, n_blocks, D)


def reference(enc_input, bias, params, *, n_heads, d_v, n_blocks):
    """Pure-JAX reference for correctness checking."""
    x = enc_input.astype(jnp.float32)
    mu = x.mean(-1, keepdims=True)
    var = jnp.square(x - mu).mean(-1, keepdims=True)
    key = (x - mu) / jnp.sqrt(var + 1e-6) * params["ln_gamma"][0] + params["ln_beta"][0]
    scores = key @ params["wk"] + params["bk"][0]                 # [BN, T, H]
    values = key @ params["wv"] + params["bv"][0]                 # [BN, T, H*d_v]
    scores = jnp.transpose(scores, (0, 2, 1)) + bias[:, :, 0, :]  # [BN, H, T]
    attn = jax.nn.softmax(scores, axis=-1)
    BN, T, D = enc_input.shape
    vals = values.reshape(BN, T, n_heads, d_v)
    ctx = jnp.einsum("bht,bthd->bhd", attn, vals).reshape(BN, n_heads * d_v)
    out = ctx @ params["wo"] + params["bo"][0]
    return out.reshape(-1, n_blocks, D)


if __name__ == "__main__":
    # Small, module-consistent shapes (BN=16 -> TB=8 -> grid of 2 steps).
    batch, n_blocks, n_tokens = 2, 8, 16
    n_heads, d_model, d_v = 4, 32, 8
    BN = batch * n_blocks

    key0 = jax.random.PRNGKey(0)
    ks = jax.random.split(key0, 12)

    enc_input = jax.random.normal(ks[0], (BN, n_tokens, d_model), jnp.float32)
    # Padding-style additive mask: constant over the query axis (as the
    # module's bias is in practice).
    mask_1d = 0.5 * jax.random.normal(ks[1], (BN, n_heads, 1, n_tokens), jnp.float32)
    bias = jnp.broadcast_to(mask_1d, (BN, n_heads, n_tokens, n_tokens))

    params = {
        "ln_gamma": 1.0 + 0.1 * jax.random.normal(ks[2], (1, d_model), jnp.float32),
        "ln_beta": 0.1 * jax.random.normal(ks[3], (1, d_model), jnp.float32),
        "wk": 0.1 * jax.random.normal(ks[4], (d_model, n_heads), jnp.float32),
        "bk": 0.1 * jax.random.normal(ks[5], (1, n_heads), jnp.float32),
        "wv": 0.1 * jax.random.normal(ks[6], (d_model, n_heads * d_v), jnp.float32),
        "bv": 0.1 * jax.random.normal(ks[7], (1, n_heads * d_v), jnp.float32),
        "wo": 0.1 * jax.random.normal(ks[8], (n_heads * d_v, d_model), jnp.float32),
        "bo": 0.1 * jax.random.normal(ks[9], (1, d_model), jnp.float32),
    }

    out = self_attention_pooling(enc_input, bias, params,
                                 n_heads=n_heads, d_v=d_v, n_blocks=n_blocks,
                                 block_rows=8)
    out = jax.block_until_ready(out)

    ref = reference(enc_input, bias, params,
                    n_heads=n_heads, d_v=d_v, n_blocks=n_blocks)
    assert out.shape == (batch, n_blocks, d_model), out.shape
    err = float(jnp.max(jnp.abs(out - ref)))
    assert jnp.allclose(out, ref, atol=2e-3, rtol=2e-3), err

    print("KERNEL_OK")
</pallas_src>

<mosaic_0001>
module attributes {stable_mosaic.version = 11 : i64} {
  func.func @_self_attn_pooling_kernel(%arg0: i32, %arg1: memref<8x16x32xf32, #tpu.memory_space<vmem>>, %arg2: memref<8x16x4xf32, #tpu.memory_space<vmem>>, %arg3: memref<1x32xf32, #tpu.memory_space<vmem>>, %arg4: memref<1x32xf32, #tpu.memory_space<vmem>>, %arg5: memref<32x36xf32, #tpu.memory_space<vmem>>, %arg6: memref<1x36xf32, #tpu.memory_space<vmem>>, %arg7: memref<32x32xf32, #tpu.memory_space<vmem>>, %arg8: memref<1x32xf32, #tpu.memory_space<vmem>>, %arg9: memref<8x32xf32, #tpu.memory_space<vmem>>) attributes {dimension_semantics = [#tpu.dimension_semantics<parallel>], iteration_bounds = array<i64: 2>, scalar_prefetch = 0 : i64, scratch_operands = 0 : i64, tpu.core_type = #tpu.core_type<tc>, window_params = [{transform_indices = @transform_0, window_bounds = array<i64: 8, 16, 32>}, {transform_indices = @transform_1, window_bounds = array<i64: 8, 16, 4>}, {pipeline_mode = #tpu.pipeline_mode<synchronous>, transform_indices = @transform_2, window_bounds = array<i64: 1, 32>}, {pipeline_mode = #tpu.pipeline_mode<synchronous>, transform_indices = @transform_3, window_bounds = array<i64: 1, 32>}, {pipeline_mode = #tpu.pipeline_mode<synchronous>, transform_indices = @transform_4, window_bounds = array<i64: 32, 36>}, {pipeline_mode = #tpu.pipeline_mode<synchronous>, transform_indices = @transform_5, window_bounds = array<i64: 1, 36>}, {pipeline_mode = #tpu.pipeline_mode<synchronous>, transform_indices = @transform_6, window_bounds = array<i64: 32, 32>}, {pipeline_mode = #tpu.pipeline_mode<synchronous>, transform_indices = @transform_7, window_bounds = array<i64: 1, 32>}, {transform_indices = @transform_8, window_bounds = array<i64: 8, 32>}]} {
    %c0 = arith.constant 0 : index
    %c0_0 = arith.constant 0 : index
    %c0_1 = arith.constant 0 : index
    %0 = vector.load %arg1[%c0, %c0_0, %c0_1] : memref<8x16x32xf32, #tpu.memory_space<vmem>>, vector<8x16x32xf32>
    %1 = vector.shape_cast %0 : vector<8x16x32xf32> to vector<128x32xf32>
    %cst = arith.constant dense<0.000000e+00> : vector<128xf32>
    %2 = vector.multi_reduction <add>, %1, %cst [1] : vector<128x32xf32> to vector<128xf32>
    %3 = vector.shape_cast %2 : vector<128xf32> to vector<128x1xf32>
    %cst_2 = arith.constant 3.200000e+01 : f32
    %4 = vector.broadcast %cst_2 : f32 to vector<128x1xf32>
    %5 = arith.divf %3, %4 : vector<128x1xf32>
    %6 = vector.broadcast %5 : vector<128x1xf32> to vector<128x32xf32>
    %7 = arith.subf %1, %6 : vector<128x32xf32>
    %8 = arith.mulf %7, %7 : vector<128x32xf32>
    %cst_3 = arith.constant dense<0.000000e+00> : vector<128xf32>
    %9 = vector.multi_reduction <add>, %8, %cst_3 [1] : vector<128x32xf32> to vector<128xf32>
    %10 = vector.shape_cast %9 : vector<128xf32> to vector<128x1xf32>
    %cst_4 = arith.constant 3.200000e+01 : f32
    %11 = vector.broadcast %cst_4 : f32 to vector<128x1xf32>
    %12 = arith.divf %10, %11 : vector<128x1xf32>
    %cst_5 = arith.constant 9.99999997E-7 : f32
    %13 = vector.broadcast %cst_5 : f32 to vector<128x1xf32>
    %14 = arith.addf %12, %13 : vector<128x1xf32>
    %15 = math.rsqrt %14 : vector<128x1xf32>
    %16 = vector.broadcast %15 : vector<128x1xf32> to vector<128x32xf32>
    %17 = arith.mulf %7, %16 : vector<128x32xf32>
    %c0_6 = arith.constant 0 : index
    %c0_7 = arith.constant 0 : index
    %18 = vector.load %arg3[%c0_6, %c0_7] : memref<1x32xf32, #tpu.memory_space<vmem>>, vector<1x32xf32>
    %19 = vector.broadcast %18 : vector<1x32xf32> to vector<128x32xf32>
    %20 = arith.mulf %17, %19 : vector<128x32xf32>
    %c0_8 = arith.constant 0 : index
    %c0_9 = arith.constant 0 : index
    %21 = vector.load %arg4[%c0_8, %c0_9] : memref<1x32xf32, #tpu.memory_space<vmem>>, vector<1x32xf32>
    %22 = vector.broadcast %21 : vector<1x32xf32> to vector<128x32xf32>
    %23 = arith.addf %20, %22 : vector<128x32xf32>
    %c0_10 = arith.constant 0 : index
    %c0_11 = arith.constant 0 : index
    %24 = vector.load %arg5[%c0_10, %c0_11] : memref<32x36xf32, #tpu.memory_space<vmem>>, vector<32x36xf32>
    %cst_12 = arith.constant dense<0.000000e+00> : vector<128x36xf32>
    %25 = tpu.matmul %23, %24, %cst_12 {dimension_numbers = #tpu.dot_dimension_numbers<[1], [0], [0], [1], [0, 0, 1, 1], [], []>} : vector<128x32xf32>, vector<32x36xf32>, vector<128x36xf32> -> vector<128x36xf32>
    %c0_13 = arith.constant 0 : index
    %c0_14 = arith.constant 0 : index
    %26 = vector.load %arg6[%c0_13, %c0_14] : memref<1x36xf32, #tpu.memory_space<vmem>>, vector<1x36xf32>
    %27 = vector.broadcast %26 : vector<1x36xf32> to vector<128x36xf32>
    %28 = arith.addf %25, %27 : vector<128x36xf32>
    %29 = vector.extract_strided_slice %28 {offsets = [0, 0], sizes = [128, 4], strides = [1, 1]} : vector<128x36xf32> to vector<128x4xf32>
    %30 = vector.extract_strided_slice %28 {offsets = [0, 4], sizes = [128, 32], strides = [1, 1]} : vector<128x36xf32> to vector<128x32xf32>
    %31 = vector.shape_cast %29 : vector<128x4xf32> to vector<8x16x4xf32>
    %c0_15 = arith.constant 0 : index
    %c0_16 = arith.constant 0 : index
    %c0_17 = arith.constant 0 : index
    %32 = vector.load %arg2[%c0_15, %c0_16, %c0_17] : memref<8x16x4xf32, #tpu.memory_space<vmem>>, vector<8x16x4xf32>
    %33 = arith.addf %31, %32 : vector<8x16x4xf32>
    %cst_18 = arith.constant dense<0xFF800000> : vector<8x4xf32>
    %34 = vector.multi_reduction <maximumf>, %33, %cst_18 [1] : vector<8x16x4xf32> to vector<8x4xf32>
    %35 = vector.shape_cast %34 : vector<8x4xf32> to vector<8x1x4xf32>
    %36 = vector.broadcast %35 : vector<8x1x4xf32> to vector<8x16x4xf32>
    %37 = arith.subf %33, %36 : vector<8x16x4xf32>
    %38 = math.exp %37 : vector<8x16x4xf32>
    %cst_19 = arith.constant dense<0.000000e+00> : vector<8x4xf32>
    %39 = vector.multi_reduction <add>, %38, %cst_19 [1] : vector<8x16x4xf32> to vector<8x4xf32>
    %40 = vector.shape_cast %39 : vector<8x4xf32> to vector<8x1x4xf32>
    %41 = vector.broadcast %40 : vector<8x1x4xf32> to vector<8x16x4xf32>
    %42 = arith.divf %38, %41 : vector<8x16x4xf32>
    %43 = vector.shape_cast %42 : vector<8x16x4xf32> to vector<128x4xf32>
    %44 = tpu.iota {dimensions = array<i32: 0>} : vector<4x32xi32>
    %45 = tpu.iota {dimensions = array<i32: 1>} : vector<4x32xi32>
    %c8_i32 = arith.constant 8 : i32
    %46 = vector.broadcast %c8_i32 : i32 to vector<4x32xi32>
    %47 = arith.muli %44, %46 : vector<4x32xi32>
    %48 = arith.cmpi sge, %45, %47 : vector<4x32xi32>
    %c1_i32 = arith.constant 1 : i32
    %49 = vector.broadcast %c1_i32 : i32 to vector<4x32xi32>
    %50 = arith.addi %44, %49 : vector<4x32xi32>
    %c8_i32_20 = arith.constant 8 : i32
    %51 = vector.broadcast %c8_i32_20 : i32 to vector<4x32xi32>
    %52 = arith.muli %50, %51 : vector<4x32xi32>
    %53 = arith.cmpi slt, %45, %52 : vector<4x32xi32>
    %54 = arith.andi %48, %53 : vector<4x32xi1>
    %cst_21 = arith.constant 1.000000e+00 : f32
    %cst_22 = arith.constant 0.000000e+00 : f32
    %55 = vector.broadcast %cst_21 : f32 to vector<4x32xf32>
    %56 = vector.broadcast %cst_22 : f32 to vector<4x32xf32>
    %57 = arith.select %54, %55, %56 : vector<4x32xi1>, vector<4x32xf32>
    %cst_23 = arith.constant dense<0.000000e+00> : vector<128x32xf32>
    %58 = tpu.matmul %43, %57, %cst_23 {dimension_numbers = #tpu.dot_dimension_numbers<[1], [0], [0], [1], [0, 0, 1, 1], [], []>} : vector<128x4xf32>, vector<4x32xf32>, vector<128x32xf32> -> vector<128x32xf32>
    %59 = arith.mulf %58, %30 : vector<128x32xf32>
    %60 = vector.shape_cast %59 : vector<128x32xf32> to vector<8x16x32xf32>
    %cst_24 = arith.constant dense<0.000000e+00> : vector<8x32xf32>
    %61 = vector.multi_reduction <add>, %60, %cst_24 [1] : vector<8x16x32xf32> to vector<8x32xf32>
    %c0_25 = arith.constant 0 : index
    %c0_26 = arith.constant 0 : index
    %62 = vector.load %arg7[%c0_25, %c0_26] : memref<32x32xf32, #tpu.memory_space<vmem>>, vector<32x32xf32>
    %cst_27 = arith.constant dense<0.000000e+00> : vector<8x32xf32>
    %63 = tpu.matmul %61, %62, %cst_27 {dimension_numbers = #tpu.dot_dimension_numbers<[1], [0], [0], [1], [0, 0, 1, 1], [], []>} : vector<8x32xf32>, vector<32x32xf32>, vector<8x32xf32> -> vector<8x32xf32>
    %c0_28 = arith.constant 0 : index
    %c0_29 = arith.constant 0 : index
    %64 = vector.load %arg8[%c0_28, %c0_29] : memref<1x32xf32, #tpu.memory_space<vmem>>, vector<1x32xf32>
    %65 = vector.broadcast %64 : vector<1x32xf32> to vector<8x32xf32>
    %66 = arith.addf %63, %65 : vector<8x32xf32>
    %c0_30 = arith.constant 0 : index
    %c0_31 = arith.constant 0 : index
    %67 = vector.load %arg9[%c0_30, %c0_31] : memref<8x32xf32, #tpu.memory_space<vmem>>, vector<8x32xf32>
    tpu.vector_store %arg9[%c0_30, %c0_31], %66 {strides = array<i32>} : memref<8x32xf32, #tpu.memory_space<vmem>>, vector<8x32xf32>,
    return
  }
  func.func @transform_0(%arg0: i32) -> (i32, i32, i32) {
    %c0_i32 = arith.constant 0 : i32
    %c0_i32_0 = arith.constant 0 : i32
    %c0_i32_1 = arith.constant 0 : i32
    return %arg0, %c0_i32, %c0_i32_0 : i32, i32, i32
  }
  func.func @transform_1(%arg0: i32) -> (i32, i32, i32) {
    %c0_i32 = arith.constant 0 : i32
    %c0_i32_0 = arith.constant 0 : i32
    %c0_i32_1 = arith.constant 0 : i32
    return %arg0, %c0_i32, %c0_i32_0 : i32, i32, i32
  }
  func.func @transform_2(%arg0: i32) -> (i32, i32) {
    %c0_i32 = arith.constant 0 : i32
    %c0_i32_0 = arith.constant 0 : i32
    %c0_i32_1 = arith.constant 0 : i32
    return %c0_i32, %c0_i32_0 : i32, i32
  }
  func.func @transform_3(%arg0: i32) -> (i32, i32) {
    %c0_i32 = arith.constant 0 : i32
    %c0_i32_0 = arith.constant 0 : i32
    %c0_i32_1 = arith.constant 0 : i32
    return %c0_i32, %c0_i32_0 : i32, i32
  }
  func.func @transform_4(%arg0: i32) -> (i32, i32) {
    %c0_i32 = arith.constant 0 : i32
    %c0_i32_0 = arith.constant 0 : i32
    %c0_i32_1 = arith.constant 0 : i32
    return %c0_i32, %c0_i32_0 : i32, i32
  }
  func.func @transform_5(%arg0: i32) -> (i32, i32) {
    %c0_i32 = arith.constant 0 : i32
    %c0_i32_0 = arith.constant 0 : i32
    %c0_i32_1 = arith.constant 0 : i32
    return %c0_i32, %c0_i32_0 : i32, i32
  }
  func.func @transform_6(%arg0: i32) -> (i32, i32) {
    %c0_i32 = arith.constant 0 : i32
    %c0_i32_0 = arith.constant 0 : i32
    %c0_i32_1 = arith.constant 0 : i32
    return %c0_i32, %c0_i32_0 : i32, i32
  }
  func.func @transform_7(%arg0: i32) -> (i32, i32) {
    %c0_i32 = arith.constant 0 : i32
    %c0_i32_0 = arith.constant 0 : i32
    %c0_i32_1 = arith.constant 0 : i32
    return %c0_i32, %c0_i32_0 : i32, i32
  }
  func.func @transform_8(%arg0: i32) -> (i32, i32) {
    %c0_i32 = arith.constant 0 : i32
    %c0_i32_0 = arith.constant 0 : i32
    return %arg0, %c0_i32 : i32, i32
  }
}

</mosaic_0001>

<bundles_post_ra>
// kernel: tpu_custom_call.1
= control target key start
LH: loop header
LB: loop body
LE: loop exit
PB: predicated region body
PF: predicated region fallthrough
CT: control target
= control target key end

     0   :  { %13 = vsyncpa [#allocation3], 0  ;;  %s2634_s0 = inlined_call_operand.vmem [shape: f32[16,16,32], index: 0, kind: input, shape index: {}]   ;;  %s2635_s1 = inlined_call_operand.vmem [shape: f32[16,16,4], index: 1, kind: input, shape index: {}]   ;;  %s2636_s2 = inlined_call_operand.vmem [shape: f32[1,32], index: 2, kind: input, shape index: {}]   ;;  %s2637_s3 = inlined_call_operand.vmem [shape: f32[1,32], index: 3, kind: input, shape index: {}]   ;;  %s2638_s4 = inlined_call_operand.vmem [shape: f32[32,36], index: 4, kind: input, shape index: {}]   ;;  %s2639_s5 = inlined_call_operand.vmem [shape: f32[1,36], index: 5, kind: input, shape index: {}]   ;;  %s2640_s6 = inlined_call_operand.vmem [shape: f32[32,32], index: 6, kind: input, shape index: {}]   ;;  %s2641_s7 = inlined_call_operand.vmem [shape: f32[1,32], index: 7, kind: input, shape index: {}]   ;;  %s2642_s8 = inlined_call_operand.hbm [shape: f32[16,32], index: 8, kind: output, shape index: {}]  }
   0x1   :  { %15 = vsyncpa [#allocation3 + $0x1], 0  ;;  %s2027_s27 = smov 0   ;;  %s2029_s28 = smov 0  }
   0x2   :  { %s2031_s29 = smov 0   ;;  %s2033_s30 = smov 0  }
   0x3 LB: > { %s2048_s9 = sadd.s32 4294967295, %s1975_s30   ;;  %s1610_s10 = sadd.s32 4294967294, %s1975_s30   ;;  %s1975_s30 = sphi %s2033_s30, %s2648_s30   ;;  %s1971_s29 = sphi %s2031_s29, %s2647_s29   ;;  %s1967_s28 = sphi %s2029_s28, %s2646_s28   ;;  %s1963_s27 = sphi %s2027_s27, %s2645_s27  }
   0x4   : > { %s2052_s11 = sadd.s32 1, %s1975_s30   ;;  %s206_s12 = sadd.s32 1, %s1971_s29 }
   0x5   : > { %s203_s13 = ssub.s32 %s1975_s30, %s2052_s11  ;;  %p216_p0 = scmp.ne.s32.totalorder %s1971_s29, %s1967_s28 }
   0x6   : > { %p204_p1 = scmp.eq.s32.totalorder %s203_s13, 0  ;;  %p217_p2 = scmp.eq.s32.totalorder %s2048_s9, 1 }
   0x7   : > { %p222_p3 = scmp.ne.s32.totalorder %s1967_s28, %s1963_s27  ;;  %p223_p4 = scmp.eq.s32.totalorder %s1610_s10, 1 }
   0x8   : > { %s2063_s14 = scalar_select %p204_p1, %s1971_s29, %s206_s12  }
   0x9   : > { %p2065_p5 = por %p217_p2, %p216_p0  ;;  %p2069_p6 = por %p223_p4, %p222_p3 }
   0xa   : > { %p1613_p7 = scmp.ge.s32.totalorder %s1975_s30, 1  ;;  %p279_p8 = scmp.lt.s32.totalorder %s1975_s30, 3 }
   0xc   : > { %p280_p9 = pnand %p1613_p7, %p279_p8 }
   0xd   : > { %s1615_s17 = sshll.u32 (!%p280_p9), %s2048_s9, 3  ;;  %vm350_vm0 = vcmask (!%p280_p9), 261120   ;;  %vm1118_vm4 = vcmask (!%p280_p9), 1043456   ;;  %vm842_vm5 = vcmask (!%p280_p9), 31744   ;;  %vm1980_vm6 = vmmov (!%p280_p9), 0   ;;  %s317_s24 = sand.u32 (!%p280_p9), 1, %s1967_s28  }
   0xe   : > { %283 = sbr.rel (%p280_p9) target bundleno = 1112 (0x458), region = 52  ;;  %p321_p10 = scmp.lt.s32.totalorder (!%p280_p9), %s1615_s17, 15  ;;  %vm1438_vm7 = vcmask (!%p280_p9), 1041409   ;;  %vm1440_vm8 = vcmask (!%p280_p9), 1042434   ;;  %vm1442_vm9 = vcmask (!%p280_p9), 1043459   ;;  %vm1444_vm10 = vcmask (!%p280_p9), 1044484  }
   0xf   : > { %vm1446_vm11 = vcmask (!%p280_p9), 1045509   ;;  %vm1448_vm12 = vcmask (!%p280_p9), 1046534   ;;  %vm1450_vm13 = vcmask (!%p280_p9), 1047559  }
  0x15   : > { %s2650_s17 = smov (!%p321_p10, %s1615_s17), 15 }
  0x16   : > { %s1663_s18 = sshll.u32 %s2650_s17, 4  ;;  %s1978_s17 = smov 124  }
  0x17   : > { %s2084_s21 = scalar_lea.vmem %s2634_s0, %s1663_s18  ;;  %s2330_s25 = scalar_lea.vmem %s2635_s1, %s1663_s18 }
  0x18   : > { %v334_v0 = vld [vmem:[%s2084_s21] sm:$0xff]  ;;  %v336_v1 = vld [vmem:[%s2084_s21 + $0x10] sm:$0xff]  ;;  %v335_v2 = vld [vmem:[%s2084_s21 + $0x8] sm:$0xff] }
  0x19   : > { %v351_v3 = vsel %vm350_vm0, %v334_v0, 0.0  ;;  %v357_v4 = vsel %vm350_vm0, %v336_v1, 0.0  ;;  %v337_v5 = vld [vmem:[%s2084_s21 + $0x18] sm:$0xff]  ;;  %v354_v6 = vsel %vm350_vm0, %v335_v2, 0.0  ;;  %v338_v8 = vld [vmem:[%s2084_s21 + $0x20] sm:$0xff]  ;;  %v339_v9 = vld [vmem:[%s2084_s21 + $0x28] sm:$0xff] }
  0x1a   : > { %352 = vadd.xlane.f32.xlu0 %v351_v3  ;;  %358 = vadd.xlane.f32.xlu1 %v357_v4  ;;  %v360_v7 = vsel %vm350_vm0, %v337_v5, 0.0  ;;  %v363_v10 = vsel %vm350_vm0, %v338_v8, 0.0  ;;  %v366_v11 = vsel %vm350_vm0, %v339_v9, 0.0  ;;  %v2099_v12 = vld [vmem:[%s2084_s21 + $0x30] sm:$0xff]  ;;  %v2102_v13 = vld [vmem:[%s2084_s21 + $0x38] sm:$0xff]  ;;  %v2109_v16 = vld [vmem:[%s2084_s21 + $0x40] sm:$0xff] }
  0x1b   : > { %v369_v14 = vsel %vm350_vm0, %v2099_v12, 0.0  ;;  %v372_v15 = vsel %vm350_vm0, %v2102_v13, 0.0  ;;  %v2112_v17 = vld [vmem:[%s2084_s21 + $0x48] sm:$0xff]  ;;  %v375_v18 = vsel %vm350_vm0, %v2109_v16, 0.0  ;;  %v2119_v20 = vld [vmem:[%s2084_s21 + $0x50] sm:$0xff]  ;;  %v2122_v21 = vld [vmem:[%s2084_s21 + $0x58] sm:$0xff] }
  0x1c   : > { %v378_v19 = vsel %vm350_vm0, %v2112_v17, 0.0  ;;  %v381_v22 = vsel %vm350_vm0, %v2119_v20, 0.0  ;;  %v384_v23 = vsel %vm350_vm0, %v2122_v21, 0.0  ;;  %v2129_v24 = vld [vmem:[%s2084_s21 + $0x60] sm:$0xff]  ;;  %v2132_v25 = vld [vmem:[%s2084_s21 + $0x68] sm:$0xff]  ;;  %v2139_v28 = vld [vmem:[%s2084_s21 + $0x70] sm:$0xff] }
  0x1d   : > { %v387_v26 = vsel %vm350_vm0, %v2129_v24, 0.0  ;;  %v390_v27 = vsel %vm350_vm0, %v2132_v25, 0.0  ;;  %v2142_v29 = vld [vmem:[%s2084_s21 + $0x78] sm:$0xff]  ;;  %v393_v30 = vsel %vm350_vm0, %v2139_v28, 0.0  ;;  %s1526_s21 = scalar_lea.sflag [#allocation3], %s317_s24 }
  0x1e   : > { %355 = vadd.xlane.f32.xlu0 %v354_v6  ;;  %361 = vadd.xlane.f32.xlu1 %v360_v7  ;;  %v396_v31 = vsel %vm350_vm0, %v2142_v29, 0.0 }
  0x22   : > { %364 = vadd.xlane.f32.xlu0 %v363_v10  ;;  %367 = vadd.xlane.f32.xlu1 %v366_v11 }
  0x26   : > { %370 = vadd.xlane.f32.xlu0 %v369_v14  ;;  %373 = vadd.xlane.f32.xlu1 %v372_v15 }
  0x2a   : > { %376 = vadd.xlane.f32.xlu0 %v375_v18  ;;  %379 = vadd.xlane.f32.xlu1 %v378_v19 }
  0x2e   : > { %382 = vadd.xlane.f32.xlu0 %v381_v22  ;;  %385 = vadd.xlane.f32.xlu1 %v384_v23 }
  0x32   : > { %388 = vadd.xlane.f32.xlu0 %v387_v26  ;;  %391 = vadd.xlane.f32.xlu1 %v390_v27 }
  0x36   : > { %394 = vadd.xlane.f32.xlu0 %v393_v30  ;;  %397 = vadd.xlane.f32.xlu1 %v396_v31 }
  0xa7   : > { %v353_v32 = vpop.xlane.xlu0 %352  ;;  %v359_v33 = vpop.xlane.xlu1 %358 }
  0xa8   : > { %v400_v34 = vmul.f32 0.03125, %v353_v32  ;;  %v402_v35 = vmul.f32 0.03125, %v359_v33 }
  0xaa   : > { %v2148_v36 = vsub.f32 %v334_v0, %v400_v34  ;;  %v2150_v37 = vsub.f32 %v336_v1, %v402_v35 }
  0xab   : > { %v356_v38 = vpop.xlane.xlu0 %355  ;;  %v362_v39 = vpop.xlane.xlu1 %361 }
  0xac   : > { %v401_v40 = vmul.f32 0.03125, %v356_v38  ;;  %v403_v41 = vmul.f32 0.03125, %v362_v39  ;;  %v432_v42 = vmul.f32 %v2148_v36, %v2148_v36  ;;  %v434_v43 = vmul.f32 %v2150_v37, %v2150_v37 }
  0xae   : > { %v2156_v44 = vsub.f32 %v335_v2, %v401_v40  ;;  %v2158_v45 = vsub.f32 %v337_v5, %v403_v41  ;;  %v448_v46 = vsel %vm350_vm0, %v432_v42, 0.0  ;;  %v454_v49 = vsel %vm350_vm0, %v434_v43, 0.0 }
  0xaf   : > { %449 = vadd.xlane.f32.xlu0 %v448_v46  ;;  %v365_v47 = vpop.xlane.xlu0 %364  ;;  %v368_v48 = vpop.xlane.xlu1 %367 }
  0xb0   : > { %v404_v50 = vmul.f32 0.03125, %v365_v47  ;;  %v405_v51 = vmul.f32 0.03125, %v368_v48  ;;  %v433_v52 = vmul.f32 %v2156_v44, %v2156_v44  ;;  %v435_v53 = vmul.f32 %v2158_v45, %v2158_v45 }
  0xb2   : > { %v2166_v54 = vsub.f32 %v338_v8, %v404_v50  ;;  %v2168_v55 = vsub.f32 %v339_v9, %v405_v51  ;;  %v451_v56 = vsel %vm350_vm0, %v433_v52, 0.0  ;;  %v457_v59 = vsel %vm350_vm0, %v435_v53, 0.0  ;;  %v607_v53 = vld [vmem:[%s2638_s4 + $0x8] sm:$0xff] }
  0xb3   : > { %455 = vadd.xlane.f32.xlu0 %v454_v49  ;;  %452 = vadd.xlane.f32.xlu1 %v451_v56  ;;  %v371_v57 = vpop.xlane.xlu0 %370  ;;  %v374_v58 = vpop.xlane.xlu1 %373 }
  0xb4   : > { %v406_v60 = vmul.f32 0.03125, %v371_v57  ;;  %v407_v61 = vmul.f32 0.03125, %v374_v58  ;;  %v436_v62 = vmul.f32 %v2166_v54, %v2166_v54  ;;  %v437_v63 = vmul.f32 %v2168_v55, %v2168_v55  ;;  %v608_v57 = vld [vmem:[%s2638_s4 + $0x10] sm:$0xff]  ;;  %v609_v58 = vld [vmem:[%s2638_s4 + $0x18] sm:$0xff] }
  0xb6   : > { %v2177_v0 = vsub.f32 %v2099_v12, %v406_v60  ;;  %v2180_v1 = vsub.f32 %v2102_v13, %v407_v61  ;;  %v460_v2 = vsel %vm350_vm0, %v436_v62, 0.0  ;;  %v463_v5 = vsel %vm350_vm0, %v437_v63, 0.0 }
  0xb7   : > { %458 = vadd.xlane.f32.xlu1 %v457_v59  ;;  %461 = vadd.xlane.f32.xlu0 %v460_v2  ;;  %v377_v3 = vpop.xlane.xlu0 %376  ;;  %v380_v4 = vpop.xlane.xlu1 %379  ;;  %v1780_v59 = vpack.c.bf16 %v609_v58, %v608_v57 }
  0xb8   : > { %v408_v6 = vmul.f32 0.03125, %v377_v3  ;;  %v409_v7 = vmul.f32 0.03125, %v380_v4  ;;  %v438_v8 = vmul.f32 %v2177_v0, %v2177_v0  ;;  %v439_v9 = vmul.f32 %v2180_v1, %v2180_v1 }
  0xba   : > { %v2189_v10 = vsub.f32 %v2109_v16, %v408_v6  ;;  %v2192_v11 = vsub.f32 %v2112_v17, %v409_v7  ;;  %v466_v12 = vsel %vm350_vm0, %v438_v8, 0.0  ;;  %v469_v15 = vsel %vm350_vm0, %v439_v9, 0.0 }
  0xbb   : > { %464 = vadd.xlane.f32.xlu1 %v463_v5  ;;  %467 = vadd.xlane.f32.xlu0 %v466_v12  ;;  %v383_v13 = vpop.xlane.xlu0 %382  ;;  %v386_v14 = vpop.xlane.xlu1 %385 }
  0xbc   : > { %v410_v18 = vmul.f32 0.03125, %v383_v13  ;;  %v411_v19 = vmul.f32 0.03125, %v386_v14  ;;  %v440_v22 = vmul.f32 %v2189_v10, %v2189_v10  ;;  %v441_v16 = vmul.f32 %v2192_v11, %v2192_v11 }
  0xbe   : > { %v2201_v23 = vsub.f32 %v2119_v20, %v410_v18  ;;  %v2204_v17 = vsub.f32 %v2122_v21, %v411_v19  ;;  %v472_v26 = vsel %vm350_vm0, %v440_v22, 0.0  ;;  %v475_v31 = vsel %vm350_vm0, %v441_v16, 0.0 }
  0xbf   : > { %470 = vadd.xlane.f32.xlu1 %v469_v15  ;;  %473 = vadd.xlane.f32.xlu0 %v472_v26  ;;  %v389_v27 = vpop.xlane.xlu0 %388  ;;  %v392_v30 = vpop.xlane.xlu1 %391 }
  0xc0   : > { %v412_v32 = vmul.f32 0.03125, %v389_v27  ;;  %v413_v33 = vmul.f32 0.03125, %v392_v30  ;;  %v442_v34 = vmul.f32 %v2201_v23, %v2201_v23  ;;  %v443_v20 = vmul.f32 %v2204_v17, %v2204_v17  ;;  %v2253_v30 = vld [vmem:[%s2636_s2] ss:$0 sm:$0xff] }
  0xc2   : > { %v2213_v35 = vsub.f32 %v2129_v24, %v412_v32  ;;  %v2216_v21 = vsub.f32 %v2132_v25, %v413_v33  ;;  %v478_v38 = vsel %vm350_vm0, %v442_v34, 0.0  ;;  %v481_v41 = vsel %vm350_vm0, %v443_v20, 0.0 }
  0xc3   : > { %476 = vadd.xlane.f32.xlu1 %v475_v31  ;;  %479 = vadd.xlane.f32.xlu0 %v478_v38  ;;  %v395_v39 = vpop.xlane.xlu0 %394  ;;  %v398_v40 = vpop.xlane.xlu1 %397  ;;  %v2259_v38 = vld [vmem:[%s2637_s3] ss:$0 sm:$0xff] }
  0xc4   : > { %v414_v42 = vmul.f32 0.03125, %v395_v39  ;;  %v415_v43 = vmul.f32 0.03125, %v398_v40  ;;  %v444_v46 = vmul.f32 %v2213_v35, %v2213_v35  ;;  %v445_v24 = vmul.f32 %v2216_v21, %v2216_v21 }
  0xc6   : > { %v2225_v47 = vsub.f32 %v2139_v28, %v414_v42  ;;  %v2228_v25 = vsub.f32 %v2142_v29, %v415_v43  ;;  %v484_v48 = vsel %vm350_vm0, %v444_v46, 0.0  ;;  %v487_v49 = vsel %vm350_vm0, %v445_v24, 0.0  ;;  %v606_v29 = vld [vmem:[%s2638_s4] sm:$0xff] }
  0xc7   : > { %482 = vadd.xlane.f32.xlu1 %v481_v41  ;;  %485 = vadd.xlane.f32.xlu0 %v484_v48  ;;  %v1776_v56 = vpack.c.bf16 %v607_v53, %v606_v29 }
  0xc8   : > { %v446_v50 = vmul.f32 %v2225_v47, %v2225_v47  ;;  %v447_v51 = vmul.f32 %v2228_v25, %v2228_v25 }
  0xc9   : > { %1777 = vmatprep.subr.bf16.mxu0 %v1776_v56 }
  0xca   : > { %v490_v52 = vsel %vm350_vm0, %v446_v50, 0.0  ;;  %v493_v28 = vsel %vm350_vm0, %v447_v51, 0.0  ;;  %1779 = vmatpush3.bf16.msra.mxu0 %v1776_v56 }
  0xcb   : > { %488 = vadd.xlane.f32.xlu1 %v487_v49  ;;  %491 = vadd.xlane.f32.xlu0 %v490_v52 }
  0xcc   : > { %1781 = vmatprep.subr.bf16.mxu0 %v1780_v59 }
  0xce   : > { %1783 = vmatpush3.bf16.msra.mxu0 %v1780_v59 }
  0xcf   : > { %494 = vadd.xlane.f32.xlu1 %v493_v28 }
 0x13c   : > { %v450_v60 = vpop.xlane.xlu0 %449 }
 0x13d   : > { %v496_v61 = vmul.f32 0.03125, %v450_v60 }
 0x13f   : > { %v512_v62 = vadd.f32 1e-06, %v496_v61 }
 0x140   : > { %v453_v63 = vpop.xlane.xlu1 %452  ;;  %v456_v2 = vpop.xlane.xlu0 %455 }
 0x141   : > { %1833 = vrsqrt.f32 %v512_v62  ;;  %v497_v3 = vmul.f32 0.03125, %v453_v63  ;;  %v498_v4 = vmul.f32 0.03125, %v456_v2 }
 0x143   : > { %v513_v5 = vadd.f32 1e-06, %v497_v3  ;;  %v514_v6 = vadd.f32 1e-06, %v498_v4 }
 0x144   : > { %v459_v7 = vpop.xlane.xlu1 %458  ;;  %v462_v8 = vpop.xlane.xlu0 %461 }
 0x145   : > { %1835 = vrsqrt.f32 %v513_v5  ;;  %v499_v9 = vmul.f32 0.03125, %v459_v7  ;;  %v500_v12 = vmul.f32 0.03125, %v462_v8 }
 0x146   : > { %1837 = vrsqrt.f32 %v514_v6 }
 0x147   : > { %v515_v13 = vadd.f32 1e-06, %v499_v9  ;;  %v516_v14 = vadd.f32 1e-06, %v500_v12 }
 0x148   : > { %v465_v15 = vpop.xlane.xlu1 %464  ;;  %v468_v18 = vpop.xlane.xlu0 %467 }
 0x149   : > { %1839 = vrsqrt.f32 %v515_v13  ;;  %v501_v19 = vmul.f32 0.03125, %v465_v15  ;;  %v502_v22 = vmul.f32 0.03125, %v468_v18 }
 0x14a   : > { %1841 = vrsqrt.f32 %v516_v14 }
 0x14b   : > { %v1834_v16 = vpop.eup %1833  ;;  %v517_v26 = vadd.f32 1e-06, %v501_v19  ;;  %v518_v27 = vadd.f32 1e-06, %v502_v22 }
 0x14c   : > { %v471_v31 = vpop.xlane.xlu1 %470  ;;  %v474_v32 = vpop.xlane.xlu0 %473  ;;  %v544_v33 = vmul.f32 %v1834_v16, %v2148_v36 }
 0x14d   : > { %1843 = vrsqrt.f32 %v517_v26  ;;  %v503_v34 = vmul.f32 0.03125, %v471_v31  ;;  %v504_v20 = vmul.f32 0.03125, %v474_v32 }
 0x14e   : > { %1845 = vrsqrt.f32 %v518_v27  ;;  %v567_v39 = vmul.f32 %v2253_v30, %v544_v33 }
 0x14f   : > { %v1836_v40 = vpop.eup %1835  ;;  %v519_v41 = vadd.f32 1e-06, %v503_v34  ;;  %v520_v42 = vadd.f32 1e-06, %v504_v20 }
 0x150   : > { %v1838_v43 = vpop.eup %1837  ;;  %v477_v46 = vpop.xlane.xlu1 %476  ;;  %v590_v48 = vadd.f32 %v2259_v38, %v567_v39  ;;  %v545_v36 = vmul.f32 %v1836_v40, %v2156_v44 }
 0x151   : > { %v480_v24 = vpop.xlane.xlu0 %479  ;;  %1847 = vrsqrt.f32 %v519_v41  ;;  %v505_v49 = vmul.f32 0.03125, %v477_v46  ;;  %v546_v51 = vmul.f32 %v1838_v43, %v2150_v37 }
 0x152   : > { %v506_v50 = vmul.f32 0.03125, %v480_v24  ;;  %1849 = vrsqrt.f32 %v520_v42  ;;  %1715 = vmatprep.mubr.msk.f32.mxu0 %vm350_vm0, %v590_v48  ;;  %v568_v52 = vmul.f32 %v2253_v30, %v545_v36 }
 0x153   : > { %v1840_v28 = vpop.eup %1839  ;;  %v521_v29 = vadd.f32 1e-06, %v505_v49  ;;  %v569_v56 = vmul.f32 %v2253_v30, %v546_v51 }
 0x154   : > { %v522_v53 = vadd.f32 1e-06, %v506_v50  ;;  %v1842_v57 = vpop.eup %1841  ;;  %v483_v58 = vpop.xlane.xlu1 %482  ;;  %v591_v44 = vadd.f32 %v2259_v38, %v568_v52  ;;  %v547_v60 = vmul.f32 %v1840_v28, %v2158_v45 }
 0x155   : > { %v486_v59 = vpop.xlane.xlu0 %485  ;;  %1851 = vrsqrt.f32 %v521_v29  ;;  %v507_v61 = vmul.f32 0.03125, %v483_v58  ;;  %v592_v62 = vadd.f32 %v2259_v38, %v569_v56  ;;  %v548_v2 = vmul.f32 %v1842_v57, %v2166_v54 }
 0x156   : > { %v508_v37 = vmul.f32 0.03125, %v486_v59  ;;  %1853 = vrsqrt.f32 %v522_v53  ;;  %1716 = vmatmul.mubr.msk.f32.vlgmr.msra.gmra.mrb[0].mxu0 %vm350_vm0, %v591_v44  ;;  %v570_v63 = vmul.f32 %v2253_v30, %v547_v60 }
 0x157   : > { %v1844_v3 = vpop.eup %1843  ;;  %v523_v4 = vadd.f32 1e-06, %v507_v61  ;;  %1718 = vmatprep.mubr.msk.f32.mxu0 %vm350_vm0, %v592_v62  ;;  %v571_v9 = vmul.f32 %v2253_v30, %v548_v2  ;;  %v1059_v62 = vlaneseq }
 0x158   : > { %v524_v5 = vadd.f32 1e-06, %v508_v37  ;;  %v1846_v6 = vpop.eup %1845  ;;  %v489_v7 = vpop.xlane.xlu1 %488  ;;  %v593_v8 = vadd.f32 %v2259_v38, %v570_v63  ;;  %v549_v12 = vmul.f32 %v1844_v3, %v2168_v55 }
 0x159   : > { %v492_v45 = vpop.xlane.xlu0 %491  ;;  %1855 = vrsqrt.f32 %v523_v4  ;;  %v509_v13 = vmul.f32 0.03125, %v489_v7  ;;  %v550_v15 = vmul.f32 %v1846_v6, %v2177_v0  ;;  %v594_v54 = vadd.f32 %v2259_v38, %v571_v9  ;;  %v811_v7 = vld [vmem:[%s2330_s25 + $0x8] sm:$0xff]  ;;  %v810_v9 = vld [vmem:[%s2330_s25] sm:$0xff] }
 0x15a   : > { %v510_v14 = vmul.f32 0.03125, %v492_v45  ;;  %1857 = vrsqrt.f32 %v524_v5  ;;  %1719 = vmatmul.mubr.msk.f32.gmra.mrb[2].mxu0 %vm350_vm0, %v593_v8  ;;  %v572_v18 = vmul.f32 %v2253_v30, %v549_v12  ;;  %v1060_v63 = vshrl.u32 %v1059_v62, 7 }
 0x15b   : > { %v1848_v19 = vpop.eup %1847  ;;  %v525_v22 = vadd.f32 1e-06, %v509_v13  ;;  %v573_v26 = vmul.f32 %v2253_v30, %v550_v15  ;;  %1721 = vmatprep.mubr.msk.f32.mxu0 %vm350_vm0, %v594_v54  ;;  %v1062_v3 = vand.u32 127, %v1059_v62  ;;  %v813_v54 = vld [vmem:[%s2330_s25 + $0x18] sm:$0xff] }
 0x15c   : > { %v526_v16 = vadd.f32 1e-06, %v510_v14  ;;  %v1850_v27 = vpop.eup %1849  ;;  %v495_v55 = vpop.xlane.xlu1 %494  ;;  %v595_v31 = vadd.f32 %v2259_v38, %v572_v18  ;;  %v551_v0 = vmul.f32 %v1848_v19, %v2180_v1  ;;  %v1065_v2 = vadd.s32 1, %v1060_v63 }
 0x15d   : > { %1859 = vrsqrt.f32 %v525_v22  ;;  %v511_v32 = vmul.f32 0.03125, %v495_v55  ;;  %v596_v33 = vadd.f32 %v2259_v38, %v573_v26  ;;  %v552_v34 = vmul.f32 %v1850_v27, %v2189_v10 }
 0x15e   : > { %1861 = vrsqrt.f32 %v526_v16  ;;  %1722 = vmatmul.mubr.msk.f32.gmra.mrb[4].mxu0 %vm350_vm0, %v595_v31  ;;  %v574_v20 = vmul.f32 %v2253_v30, %v551_v0  ;;  %v1063_v4 = vmul.u32 8, %v1060_v63  ;;  %v1066_v5 = vmul.u32 8, %v1065_v2  ;;  %v812_v16 = vld [vmem:[%s2330_s25 + $0x10] sm:$0xff] }
 0x15f   : > { %v1852_v39 = vpop.eup %1851  ;;  %v527_v40 = vadd.f32 1e-06, %v511_v32  ;;  %1724 = vmatprep.mubr.msk.f32.mxu0 %vm350_vm0, %v596_v33  ;;  %v575_v41 = vmul.f32 %v2253_v30, %v552_v34  ;;  %v815_v33 = vld [vmem:[%s2330_s25 + $0x28] sm:$0xff] }
 0x160   : > { %v1854_v42 = vpop.eup %1853  ;;  %v597_v1 = vadd.f32 %v2259_v38, %v574_v20  ;;  %v553_v43 = vmul.f32 %v1852_v39, %v2192_v11  ;;  %vm1064_vm1 = vcmp.ge.s32.totalorder %v1062_v3, %v1063_v4  ;;  %vm1067_vm2 = vcmp.lt.s32.totalorder %v1062_v3, %v1066_v5 }
 0x161   : > { %1863 = vrsqrt.f32 %v527_v40  ;;  %v598_v46 = vadd.f32 %v2259_v38, %v575_v41  ;;  %v554_v10 = vmul.f32 %v1854_v42, %v2201_v23  ;;  %vm1068_vm3 = vmand %vm1064_vm1, %vm1067_vm2  ;;  %v814_v41 = vld [vmem:[%s2330_s25 + $0x20] sm:$0xff] }
 0x162   : > { %1725 = vmatmul.mubr.msk.f32.gmra.mrb[6].mxu0 %vm350_vm0, %v597_v1  ;;  %v576_v24 = vmul.f32 %v2253_v30, %v553_v43 }
 0x163   : > { %v1856_v48 = vpop.eup %1855  ;;  %1727 = vmatprep.mubr.msk.f32.mxu0 %vm350_vm0, %v598_v46  ;;  %v577_v36 = vmul.f32 %v2253_v30, %v554_v10 }
 0x164   : > { %v1858_v49 = vpop.eup %1857  ;;  %v599_v50 = vadd.f32 %v2259_v38, %v576_v24  ;;  %v555_v51 = vmul.f32 %v1856_v48, %v2204_v17 }
 0x165   : > { %v600_v11 = vadd.f32 %v2259_v38, %v577_v36  ;;  %v556_v52 = vmul.f32 %v1858_v49, %v2213_v35  ;;  %v817_v36 = vld [vmem:[%s2330_s25 + $0x38] sm:$0xff] }
 0x166   : > { %1728 = vmatmul.mubr.msk.f32.gmra.mrb[8].mxu0 %vm350_vm0, %v599_v50  ;;  %v578_v23 = vmul.f32 %v2253_v30, %v555_v51 }
 0x167   : > { %v1860_v28 = vpop.eup %1859  ;;  %1730 = vmatprep.mubr.msk.f32.mxu0 %vm350_vm0, %v600_v11  ;;  %v579_v29 = vmul.f32 %v2253_v30, %v556_v52 }
 0x168   : > { %v1862_v53 = vpop.eup %1861  ;;  %v601_v56 = vadd.f32 %v2259_v38, %v578_v23  ;;  %v557_v57 = vmul.f32 %v1860_v28, %v2216_v21  ;;  %v816_v23 = vld [vmem:[%s2330_s25 + $0x30] sm:$0xff] }
 0x169   : > { %v602_v17 = vadd.f32 %v2259_v38, %v579_v29  ;;  %v558_v58 = vmul.f32 %v1862_v53, %v2225_v47 }
 0x16a   : > { %1731 = vmatmul.mubr.msk.f32.gmra.mrb[10].mxu0 %vm350_vm0, %v601_v56  ;;  %v580_v35 = vmul.f32 %v2253_v30, %v557_v57 }
 0x16b   : > { %v1864_v59 = vpop.eup %1863  ;;  %1733 = vmatprep.mubr.msk.f32.mxu0 %vm350_vm0, %v602_v17  ;;  %v581_v44 = vmul.f32 %v2253_v30, %v558_v58 }
 0x16c   : > { %v603_v60 = vadd.f32 %v2259_v38, %v580_v35  ;;  %v559_v61 = vmul.f32 %v1864_v59, %v2228_v25  ;;  %v1977_v25 = vmov 0.0   ;;  %v819_v59 = vld [vmem:[%s2330_s25 + $0x48] sm:$0xff] }
 0x16d   : > { %v604_v37 = vadd.f32 %v2259_v38, %v581_v44  ;;  %v1069_v6 = vsel %vm1068_vm3, 1.0, %v1977_v25 }
 0x16e   : > { %1734 = vmatmul.mubr.msk.f32.gmra.mrb[12].mxu0 %vm350_vm0, %v603_v60  ;;  %v582_v21 = vmul.f32 %v2253_v30, %v559_v61  ;;  %1739 = vmatprep.subr.msk.mxu1 %vm1118_vm4, %v1069_v6  ;;  %v2335_v30 = vld [vmem:[%s2639_s5] ss:$0 sm:$0xff] }
 0x16f   : > { %1736 = vmatprep.mubr.msk.f32.mxu0 %vm350_vm0, %v604_v37  ;;  %1740 = vmatpush3.msk.msra.mxu1 %vm1118_vm4, %v1069_v6 }
 0x170   : > { %v605_v47 = vadd.f32 %v2259_v38, %v582_v21 }
 0x172   : > { %1737 = vmatmul.mubr.msk.f32.gmra.mrb[14].mxu0 %vm350_vm0, %v605_v47  ;;  %v818_v47 = vld [vmem:[%s2330_s25 + $0x40] sm:$0xff] }
 0x229   : > { %v1717_v38 = vpop.f32.mrb[0].mxu0 }
 0x22a   : > { %v737_v45 = vadd.f32 %v1717_v38, %v2335_v30  ;;  %v731_v8 = vpop.f32.mrb[1].mxu0 }
 0x22b   : > { %v732_v12 = vadd.f32 %v2335_v30, %v731_v8 }
 0x22c   : > { %v2341_v13 = vadd.f32 %v811_v7, %v737_v45  ;;  %1285 = vrot.lane.b32.xlu1 %v737_v45, %s1978_s17 }
 0x22d   : > { %v2344_v14 = vadd.f32 %v810_v9, %v732_v12  ;;  %1283 = vrot.lane.b32.xlu0 %v732_v12, %s1978_s17  ;;  %v1720_v15 = vpop.f32.mrb[2].mxu0 }
 0x22e   : > { %v844_v18 = vsel %vm842_vm5, %v2341_v13, -inf  ;;  %v747_v19 = vadd.f32 %v1720_v15, %v2335_v30  ;;  %v741_v22 = vpop.f32.mrb[3].mxu0 }
 0x22f   : > { %v843_v26 = vsel %vm842_vm5, %v2344_v14, -inf  ;;  %v742_v27 = vadd.f32 %v2335_v30, %v741_v22 }
 0x230   : > { %v845_v55 = vmax.f32 %v843_v26, %v844_v18  ;;  %v2355_v31 = vadd.f32 %v813_v54, %v747_v19  ;;  %1289 = vrot.lane.b32.xlu1 %v747_v19, %s1978_s17  ;;  %v821_v54 = vld [vmem:[%s2330_s25 + $0x58] sm:$0xff] }
 0x231   : > { %v2358_v0 = vadd.f32 %v812_v16, %v742_v27  ;;  %v1723_v32 = vpop.f32.mrb[4].mxu0 }
 0x232   : > { %v846_v34 = vrot.slane %v845_v55, 4  ;;  %v853_v20 = vsel %vm842_vm5, %v2355_v31, -inf  ;;  %v757_v39 = vadd.f32 %v1723_v32, %v2335_v30  ;;  %v751_v40 = vpop.f32.mrb[5].mxu0 }
 0x233   : > { %v852_v42 = vsel %vm842_vm5, %v2358_v0, -inf  ;;  %v752_v1 = vadd.f32 %v2335_v30, %v751_v40 }
 0x234   : > { %v847_v43 = vmax.f32 %v845_v55, %v846_v34  ;;  %v854_v46 = vmax.f32 %v852_v42, %v853_v20  ;;  %v2368_v10 = vadd.f32 %v815_v33, %v757_v39  ;;  %1287 = vrot.lane.b32.xlu1 %v742_v27, %s1978_s17 }
 0x235   : > { %v2371_v24 = vadd.f32 %v814_v41, %v752_v1  ;;  %1291 = vrot.lane.b32.xlu0 %v752_v1, %s1978_s17  ;;  %v1726_v48 = vpop.f32.mrb[6].mxu0 }
 0x236   : > { %v848_v49 = vrot.slane %v847_v43, 2  ;;  %v855_v50 = vrot.slane %v854_v46, 4  ;;  %v862_v51 = vsel %vm842_vm5, %v2368_v10, -inf  ;;  %v767_v11 = vadd.f32 %v1726_v48, %v2335_v30  ;;  %v761_v52 = vpop.f32.mrb[7].mxu0 }
 0x237   : > { %v861_v28 = vsel %vm842_vm5, %v2371_v24, -inf  ;;  %v762_v29 = vadd.f32 %v2335_v30, %v761_v52 }
 0x238   : > { %v849_v53 = vmax.f32 %v847_v43, %v848_v49  ;;  %v856_v56 = vmax.f32 %v854_v46, %v855_v50  ;;  %v863_v57 = vmax.f32 %v861_v28, %v862_v51  ;;  %v2382_v17 = vadd.f32 %v817_v36, %v767_v11  ;;  %1293 = vrot.lane.b32.xlu1 %v757_v39, %s1978_s17  ;;  %v820_v39 = vld [vmem:[%s2330_s25 + $0x50] sm:$0xff] }
 0x239   : > { %v2385_v58 = vadd.f32 %v816_v23, %v762_v29  ;;  %1295 = vrot.lane.b32.xlu0 %v762_v29, %s1978_s17  ;;  %v1729_v35 = vpop.f32.mrb[8].mxu0  ;;  %v823_v23 = vld [vmem:[%s2330_s25 + $0x68] sm:$0xff]  ;;  %v822_v29 = vld [vmem:[%s2330_s25 + $0x60] sm:$0xff] }
 0x23a   : > { %v850_v44 = vrot.slane %v849_v53, 1  ;;  %v857_v60 = vrot.slane %v856_v56, 2  ;;  %v864_v61 = vrot.slane %v863_v57, 4  ;;  %v871_v37 = vsel %vm842_vm5, %v2382_v17, -inf  ;;  %v771_v21 = vpop.f32.mrb[9].mxu0 }
 0x23b   : > { %v870_v62 = vsel %vm842_vm5, %v2385_v58, -inf  ;;  %v777_v63 = vadd.f32 %v1729_v35, %v2335_v30  ;;  %v772_v2 = vadd.f32 %v2335_v30, %v771_v21 }
 0x23c   : > { %v851_v3 = vmax.f32 %v849_v53, %v850_v44  ;;  %v858_v4 = vmax.f32 %v856_v56, %v857_v60  ;;  %v865_v5 = vmax.f32 %v863_v57, %v864_v61  ;;  %v872_v6 = vmax.f32 %v870_v62, %v871_v37  ;;  %1297 = vrot.lane.b32.xlu1 %v767_v11, %s1978_s17 }
 0x23d   : > { %v2397_v38 = vadd.f32 %v819_v59, %v777_v63  ;;  %v2399_v7 = vadd.f32 %v818_v47, %v772_v2  ;;  %1299 = vrot.lane.b32.xlu0 %v772_v2, %s1978_s17  ;;  %v1732_v45 = vpop.f32.mrb[10].mxu0 }
 0x23e   : > { %v915_v8 = vsub.f32 %v2344_v14, %v851_v3  ;;  %v916_v9 = vsub.f32 %v2341_v13, %v851_v3  ;;  %v859_v12 = vrot.slane %v858_v4, 1  ;;  %v866_v15 = vrot.slane %v865_v5, 2  ;;  %v781_v18 = vpop.f32.mrb[11].mxu0  ;;  %v825_v3 = vld [vmem:[%s2330_s25 + $0x78] sm:$0xff] }
 0x23f   : > { %v873_v19 = vrot.slane %v872_v6, 4  ;;  %v880_v22 = vsel %vm842_vm5, %v2397_v38, -inf  ;;  %v879_v16 = vsel %vm842_vm5, %v2399_v7, -inf  ;;  %v787_v26 = vadd.f32 %v1732_v45, %v2335_v30 }
 0x240   : > { %v931_v27 = vmul.f32 1.442695, %v915_v8  ;;  %v933_v55 = vmul.f32 1.442695, %v916_v9  ;;  %v860_v32 = vmax.f32 %v858_v4, %v859_v12  ;;  %v867_v14 = vmax.f32 %v865_v5, %v866_v15  ;;  %1301 = vrot.lane.b32.xlu1 %v777_v63, %s1978_s17  ;;  %v824_v4 = vld [vmem:[%s2330_s25 + $0x70] sm:$0xff]  ;;  %s1614_s25 = sshll.u32 %s317_s24, 3 }
 0x241   : > { %v874_v13 = vmax.f32 %v872_v6, %v873_v19  ;;  %v881_v33 = vmax.f32 %v879_v16, %v880_v22  ;;  %v2411_v34 = vadd.f32 %v821_v54, %v787_v26  ;;  %v782_v20 = vadd.f32 %v2335_v30, %v781_v18  ;;  %v1735_v40 = vpop.f32.mrb[12].mxu0  ;;  %s319_s18 = scalar_lea.vmem [#allocation2], %s1614_s25 }
 0x242   : > { %1865 = vpow2.f32 %v931_v27  ;;  %v917_v41 = vsub.f32 %v2358_v0, %v860_v32  ;;  %v918_v42 = vsub.f32 %v2355_v31, %v860_v32  ;;  %v868_v1 = vrot.slane %v867_v14, 1  ;;  %v791_v43 = vpop.f32.mrb[13].mxu0  ;;  %s1539_s12 = sshll.u32 %s319_s18, 4  ;;  %s2593_s12 = int_to_ptr.vmem [resolvable:$true] %s1539_s12 }
 0x243   : > { %1867 = vpow2.f32 %v933_v55  ;;  %v875_v46 = vrot.slane %v874_v13, 2  ;;  %v882_v48 = vrot.slane %v881_v33, 4  ;;  %v889_v36 = vsel %vm842_vm5, %v2411_v34, -inf  ;;  %1303 = vrot.lane.b32.xlu0 %v782_v20, %s1978_s17  ;;  %s1913_s22 = scalar_lea.vmem %s2593_s12, 128 }
 0x244   : > { %v935_v49 = vmul.f32 1.442695, %v917_v41  ;;  %v937_v50 = vmul.f32 1.442695, %v918_v42  ;;  %v869_v51 = vmax.f32 %v867_v14, %v868_v1  ;;  %v2420_v11 = vadd.f32 %v820_v39, %v782_v20  ;;  %1305 = vrot.lane.b32.xlu1 %v787_v26, %s1978_s17  ;;  %p1914_p11 = scmp.ne.s32.totalorder %s2593_s12, %s1913_s22 }
 0x245   : > { %v876_v31 = vmax.f32 %v874_v13, %v875_v46  ;;  %v883_v0 = vmax.f32 %v881_v33, %v882_v48  ;;  %v797_v52 = vadd.f32 %v1735_v40, %v2335_v30  ;;  %v792_v28 = vadd.f32 %v2335_v30, %v791_v43  ;;  %v1738_v53 = vpop.f32.mrb[14].mxu0 }
 0x246   : > { %1869 = vpow2.f32 %v935_v49  ;;  %v919_v56 = vsub.f32 %v2371_v24, %v869_v51  ;;  %v920_v57 = vsub.f32 %v2368_v10, %v869_v51  ;;  %v888_v35 = vsel %vm842_vm5, %v2420_v11, -inf  ;;  %v801_v59 = vpop.f32.mrb[15].mxu0  ;;  %p1915_p12 = pnand %p1914_p11, %p2065_p5 }
 0x247   : > { %1871 = vpow2.f32 %v937_v50  ;;  %v877_v44 = vrot.slane %v876_v31, 1  ;;  %v884_v60 = vrot.slane %v883_v0, 2  ;;  %v890_v61 = vmax.f32 %v888_v35, %v889_v36  ;;  %1307 = vrot.lane.b32.xlu0 %v792_v28, %s1978_s17 }
 0x248   : > { %v939_v37 = vmul.f32 1.442695, %v919_v56  ;;  %v941_v21 = vmul.f32 1.442695, %v920_v57  ;;  %v2432_v47 = vadd.f32 %v823_v23, %v797_v52  ;;  %v2434_v62 = vadd.f32 %v822_v29, %v792_v28  ;;  %1309 = vrot.lane.b32.xlu1 %v797_v52, %s1978_s17  ;;  %p1916_p13 = pneg %p1915_p12 }
 0x249   : > { %v878_v10 = vmax.f32 %v876_v31, %v877_v44  ;;  %v885_v24 = vmax.f32 %v883_v0, %v884_v60  ;;  %v891_v63 = vrot.slane %v890_v61, 4  ;;  %v807_v2 = vadd.f32 %v1738_v53, %v2335_v30 }
 0x24a   : > { %1873 = vpow2.f32 %v939_v37  ;;  %v898_v5 = vsel %vm842_vm5, %v2432_v47, -inf  ;;  %v897_v6 = vsel %vm842_vm5, %v2434_v62, -inf  ;;  %v802_v45 = vadd.f32 %v2335_v30, %v801_v59 }
 0x24b   : > { %1875 = vpow2.f32 %v941_v21  ;;  %v921_v8 = vsub.f32 %v2385_v58, %v878_v10  ;;  %v922_v9 = vsub.f32 %v2382_v17, %v878_v10  ;;  %v886_v12 = vrot.slane %v885_v24, 1 }
 0x24c   : > { %v2447_v15 = vpop.eup %1865  ;;  %v892_v54 = vmax.f32 %v890_v61, %v891_v63  ;;  %v899_v18 = vmax.f32 %v897_v6, %v898_v5  ;;  %v2449_v19 = vadd.f32 %v825_v3, %v807_v2  ;;  %v2451_v22 = vadd.f32 %v824_v4, %v802_v45  ;;  %1311 = vrot.lane.b32.xlu0 %v802_v45, %s1978_s17 }
 0x24d   : > { %v2454_v16 = vpop.eup %1867  ;;  %v963_v30 = vsel %vm842_vm5, %v2447_v15, 0.0  ;;  %v943_v26 = vmul.f32 1.442695, %v921_v8  ;;  %v945_v58 = vmul.f32 1.442695, %v922_v9  ;;  %v887_v27 = vmax.f32 %v885_v24, %v886_v12  ;;  %1313 = vrot.lane.b32.xlu1 %v807_v2, %s1978_s17  ;;  %s1660_s17 = sshll.u32 %s2048_s9, 7 }
 0x24e   : > { %v964_v17 = vsel %vm842_vm5, %v2454_v16, 0.0  ;;  %v893_v55 = vrot.slane %v892_v54, 2  ;;  %v900_v32 = vrot.slane %v899_v18, 4  ;;  %v907_v14 = vsel %vm842_vm5, %v2449_v19, -inf  ;;  %s2591_s20 = scalar_lea.hbm %s2642_s8, %s1660_s17  ;;  %s1981_s9 = smov [#allocation2]  }
 0x24f   : > { %v965_v13 = vadd.f32 %v964_v17, %v963_v30  ;;  %1877 = vpow2.f32 %v943_v26  ;;  %v923_v33 = vsub.f32 %v2399_v7, %v887_v27  ;;  %v924_v20 = vsub.f32 %v2397_v38, %v887_v27  ;;  %s1917_s23 = sshll.u32 %s1981_s9, 4  ;;  %s1918_s23 = int_to_ptr.vmem [resolvable:$false] %s1917_s23 }
 0x250   : > { %v2465_v39 = vpop.eup %1869  ;;  %1879 = vpow2.f32 %v945_v58  ;;  %v894_v40 = vmax.f32 %v892_v54, %v893_v55  ;;  %v901_v41 = vmax.f32 %v899_v18, %v900_v32  ;;  %v906_v42 = vsel %vm842_vm5, %v2451_v22, -inf  ;;  %s1919_s25 = scalar_lea.vmem %s1918_s23, 256  ;;  %p1920_p0 = scmp.lt.s32.totalorder %s2593_s12, %s1918_s23 }
 0x251   : > { %v2469_v1 = vpop.eup %1871  ;;  %v972_v43 = vsel %vm842_vm5, %v2465_v39, 0.0  ;;  %v947_v46 = vmul.f32 1.442695, %v923_v33  ;;  %v949_v48 = vmul.f32 1.442695, %v924_v20  ;;  %v908_v36 = vmax.f32 %v906_v42, %v907_v14  ;;  %p1921_p1 = scmp.lt.s32.totalorder %s1919_s25, %s1913_s22 }
 0x252   : > { %v973_v7 = vsel %vm842_vm5, %v2469_v1, 0.0  ;;  %v895_v38 = vrot.slane %v894_v40, 1  ;;  %v902_v49 = vrot.slane %v901_v41, 2  ;;  %v966_v50 = vrot.slane %v965_v13, 4 }
 0x253   : > { %v974_v51 = vadd.f32 %v973_v7, %v972_v43  ;;  %1881 = vpow2.f32 %v947_v46  ;;  %v909_v31 = vrot.slane %v908_v36, 4  ;;  %p1922_p2 = por %p1921_p1, %p1920_p0 }
 0x254   : > { %v2475_v0 = vpop.eup %1873  ;;  %1883 = vpow2.f32 %v949_v48  ;;  %v896_v52 = vmax.f32 %v894_v40, %v895_v38  ;;  %v903_v23 = vmax.f32 %v901_v41, %v902_v49  ;;  %v967_v28 = vadd.f32 %v966_v50, %v965_v13 }
 0x255   : > { %v2477_v29 = vpop.eup %1875  ;;  %v975_v53 = vrot.slane %v974_v51, 4  ;;  %v981_v56 = vsel %vm842_vm5, %v2475_v0, 0.0  ;;  %v910_v57 = vmax.f32 %v908_v36, %v909_v31  ;;  %p1923_p3 = pnand %p1922_p2, %p1916_p13 }
 0x256   : > { %v982_v35 = vsel %vm842_vm5, %v2477_v29, 0.0  ;;  %v925_v59 = vsub.f32 %v2420_v11, %v896_v52  ;;  %v926_v44 = vsub.f32 %v2411_v34, %v896_v52  ;;  %v904_v60 = vrot.slane %v903_v23, 1 }
 0x257   : > { %v976_v61 = vadd.f32 %v975_v53, %v974_v51  ;;  %v983_v37 = vadd.f32 %v982_v35, %v981_v56  ;;  %v911_v21 = vrot.slane %v910_v57, 2  ;;  %v968_v10 = vrot.slane %v967_v28, 2 }
 0x258   : > { %v951_v24 = vmul.f32 1.442695, %v925_v59  ;;  %v953_v63 = vmul.f32 1.442695, %v926_v44  ;;  %v905_v2 = vmax.f32 %v903_v23, %v904_v60 }
 0x259   : > { %v2485_v3 = vpop.eup %1877  ;;  %v977_v4 = vrot.slane %v976_v61, 2  ;;  %v984_v5 = vrot.slane %v983_v37, 4  ;;  %v912_v6 = vmax.f32 %v910_v57, %v911_v21  ;;  %v969_v45 = vadd.f32 %v968_v10, %v967_v28 }
 0x25a   : > { %v2487_v8 = vpop.eup %1879  ;;  %v990_v11 = vsel %vm842_vm5, %v2485_v3, 0.0  ;;  %1885 = vpow2.f32 %v951_v24  ;;  %v927_v34 = vsub.f32 %v2434_v62, %v905_v2  ;;  %v928_v9 = vsub.f32 %v2432_v47, %v905_v2 }
 0x25b   : > { %v985_v12 = vadd.f32 %v984_v5, %v983_v37  ;;  %v991_v54 = vsel %vm842_vm5, %v2487_v8, 0.0  ;;  %1887 = vpow2.f32 %v953_v63  ;;  %v913_v18 = vrot.slane %v912_v6, 1 }
 0x25c   : > { %v992_v30 = vadd.f32 %v991_v54, %v990_v11  ;;  %v955_v26 = vmul.f32 1.442695, %v927_v34  ;;  %v957_v58 = vmul.f32 1.442695, %v928_v9  ;;  %v970_v27 = vrot.slane %v969_v45, 1 }
 0x25d   : > { %v2495_v17 = vpop.eup %1881  ;;  %v986_v55 = vrot.slane %v985_v12, 2  ;;  %v914_v32 = vmax.f32 %v912_v6, %v913_v18  ;;  %v978_v14 = vadd.f32 %v977_v4, %v976_v61 }
 0x25e   : > { %v2497_v13 = vpop.eup %1883  ;;  %v993_v62 = vrot.slane %v992_v30, 4  ;;  %v999_v47 = vsel %vm842_vm5, %v2495_v17, 0.0  ;;  %1889 = vpow2.f32 %v955_v26  ;;  %v971_v33 = vadd.f32 %v970_v27, %v969_v45 }
 0x25f   : > { %v1000_v20 = vsel %vm842_vm5, %v2497_v13, 0.0  ;;  %1891 = vpow2.f32 %v957_v58  ;;  %v929_v40 = vsub.f32 %v2451_v22, %v914_v32  ;;  %v930_v41 = vsub.f32 %v2449_v19, %v914_v32 }
 0x260   : > { %v994_v42 = vadd.f32 %v993_v62, %v992_v30  ;;  %v1001_v43 = vadd.f32 %v1000_v20, %v999_v47  ;;  %1893 = vrcp.f32 %v971_v33  ;;  %v979_v46 = vrot.slane %v978_v14, 1 }
 0x261   : > { %v959_v48 = vmul.f32 1.442695, %v929_v40  ;;  %v961_v36 = vmul.f32 1.442695, %v930_v41  ;;  %v987_v7 = vadd.f32 %v986_v55, %v985_v12 }
 0x262   : > { %v995_v38 = vrot.slane %v994_v42, 2  ;;  %v1002_v49 = vrot.slane %v1001_v43, 4  ;;  %v980_v50 = vadd.f32 %v979_v46, %v978_v14 }
 0x263   : > { %1895 = vpow2.f32 %v959_v48  ;;  %v988_v51 = vrot.slane %v987_v7, 1 }
 0x264   : > { %v2505_v31 = vpop.eup %1885  ;;  %v1003_v52 = vadd.f32 %v1002_v49, %v1001_v43  ;;  %1897 = vpow2.f32 %v961_v36  ;;  %v996_v23 = vadd.f32 %v995_v38, %v994_v42 }
 0x265   : > { %v2507_v22 = vpop.eup %1887  ;;  %v1008_v19 = vsel %vm842_vm5, %v2505_v31, 0.0  ;;  %1899 = vrcp.f32 %v980_v50  ;;  %v989_v28 = vadd.f32 %v988_v51, %v987_v7 }
 0x266   : > { %v1004_v53 = vrot.slane %v1003_v52, 2  ;;  %v1009_v56 = vsel %vm842_vm5, %v2507_v22, 0.0  ;;  %v997_v57 = vrot.slane %v996_v23, 1 }
 0x267   : > { %v1010_v35 = vadd.f32 %v1009_v56, %v1008_v19  ;;  %1901 = vrcp.f32 %v989_v28  ;;  %v1979_v28 = vmov 0.0|0.0   ;;  %v1421_v56 = vld [vmem:[%s2640_s6 + $0x10] sm:$0xff] }
 0x268   : > { %v2513_v59 = vpop.eup %1889  ;;  %v998_v44 = vadd.f32 %v997_v57, %v996_v23  ;;  %v1005_v60 = vadd.f32 %v1004_v53, %v1003_v52  ;;  %1784 = vmatprep.subr.bf16.mxu1 %v1979_v28  ;;  %v1422_v57 = vld [vmem:[%s2640_s6 + $0x18] sm:$0xff] }
 0x269   : > { %v2515_v61 = vpop.eup %1891  ;;  %v1011_v37 = vrot.slane %v1010_v35, 4  ;;  %v1017_v21 = vsel %vm842_vm5, %v2513_v59, 0.0 }
 0x26a   : > { %v1894_v10 = vpop.eup %1893  ;;  %v1018_v24 = vsel %vm842_vm5, %v2515_v61, 0.0  ;;  %1903 = vrcp.f32 %v998_v44  ;;  %v1006_v63 = vrot.slane %v1005_v60, 1 }
 0x26b   : > { %v1012_v2 = vadd.f32 %v1011_v37, %v1010_v35  ;;  %v1019_v4 = vadd.f32 %v1018_v24, %v1017_v21  ;;  %v1036_v5 = vmul.f32 %v1894_v10, %v2447_v15  ;;  %v1037_v6 = vmul.f32 %v1894_v10, %v2454_v16 }
 0x26c   : > { %v1007_v45 = vadd.f32 %v1006_v63, %v1005_v60  ;;  %v1788_v35 = vpack.c.bf16 %v1422_v57, %v1421_v56 }
 0x26d   : > { %v1896_v11 = vpop.eup %1895  ;;  %v1013_v34 = vrot.slane %v1012_v2, 2  ;;  %v1020_v9 = vrot.slane %v1019_v4, 4  ;;  %1741 = vmatprep.mubr.msk.f32.mxu1 %vm842_vm5, %v1036_v5 }
 0x26e   : > { %v1898_v12 = vpop.eup %1897  ;;  %v1026_v54 = vsel %vm842_vm5, %v1896_v11, 0.0  ;;  %1742 = vmatmul.mubr.msk.f32.vlgmr.msra.gmra.mrb[0].mxu1 %vm842_vm5, %v1037_v6  ;;  %1905 = vrcp.f32 %v1007_v45 }
 0x26f   : > { %v1900_v18 = vpop.eup %1899  ;;  %v1021_v30 = vadd.f32 %v1020_v9, %v1019_v4  ;;  %v1027_v26 = vsel %vm842_vm5, %v1898_v12, 0.0  ;;  %v1014_v58 = vadd.f32 %v1013_v34, %v1012_v2 }
 0x270   : > { %v1028_v15 = vadd.f32 %v1027_v26, %v1026_v54  ;;  %v1039_v16 = vmul.f32 %v1900_v18, %v2465_v39  ;;  %v1040_v27 = vmul.f32 %v1900_v18, %v2469_v1 }
 0x271   : > { %v1902_v55 = vpop.eup %1901  ;;  %v1022_v32 = vrot.slane %v1021_v30, 2  ;;  %v1015_v14 = vrot.slane %v1014_v58, 1 }
 0x272   : > { %v1029_v62 = vrot.slane %v1028_v15, 4  ;;  %1744 = vmatprep.mubr.msk.f32.mxu1 %vm842_vm5, %v1039_v16  ;;  %v1042_v47 = vmul.f32 %v1902_v55, %v2475_v0  ;;  %v1043_v33 = vmul.f32 %v1902_v55, %v2477_v29 }
 0x273   : > { %1745 = vmatmul.mubr.msk.f32.gmra.mrb[2].mxu1 %vm842_vm5, %v1040_v27  ;;  %v1016_v20 = vadd.f32 %v1015_v14, %v1014_v58  ;;  %v1023_v40 = vadd.f32 %v1022_v32, %v1021_v30 }
 0x274   : > { %v1904_v41 = vpop.eup %1903  ;;  %v1030_v42 = vadd.f32 %v1029_v62, %v1028_v15  ;;  %1747 = vmatprep.mubr.msk.f32.mxu1 %vm842_vm5, %v1042_v47 }
 0x275   : > { %v1045_v39 = vmul.f32 %v1904_v41, %v2485_v3  ;;  %v1046_v1 = vmul.f32 %v1904_v41, %v2487_v8  ;;  %1907 = vrcp.f32 %v1016_v20  ;;  %v1024_v43 = vrot.slane %v1023_v40, 1 }
 0x276   : > { %v1031_v46 = vrot.slane %v1030_v42, 2 }
 0x277   : > { %1748 = vmatmul.mubr.msk.f32.gmra.mrb[4].mxu1 %vm842_vm5, %v1043_v33  ;;  %v1025_v0 = vadd.f32 %v1024_v43, %v1023_v40 }
 0x278   : > { %v1906_v48 = vpop.eup %1905  ;;  %1750 = vmatprep.mubr.msk.f32.mxu1 %vm842_vm5, %v1045_v39  ;;  %v1032_v29 = vadd.f32 %v1031_v46, %v1030_v42 }
 0x279   : > { %v1048_v36 = vmul.f32 %v1906_v48, %v2495_v17  ;;  %v1049_v7 = vmul.f32 %v1906_v48, %v2497_v13  ;;  %1909 = vrcp.f32 %v1025_v0 }
 0x27a   : > { %v1033_v38 = vrot.slane %v1032_v29, 1 }
 0x27b   : > { %1751 = vmatmul.mubr.msk.f32.gmra.mrb[6].mxu1 %vm842_vm5, %v1046_v1 }
 0x27c   : > { %1753 = vmatprep.mubr.msk.f32.mxu1 %vm842_vm5, %v1048_v36  ;;  %v1034_v3 = vadd.f32 %v1033_v38, %v1032_v29 }
 0x27e   : > { %1911 = vrcp.f32 %v1034_v3 }
 0x27f   : > { %v1908_v8 = vpop.eup %1907  ;;  %1754 = vmatmul.mubr.msk.f32.gmra.mrb[8].mxu1 %vm842_vm5, %v1049_v7 }
 0x280   : > { %v1051_v49 = vmul.f32 %v1908_v8, %v2505_v31  ;;  %v1052_v50 = vmul.f32 %v1908_v8, %v2507_v22  ;;  %v1419_v31 = vld [vmem:[%s2640_s6] sm:$0xff]  ;;  %v1420_v22 = vld [vmem:[%s2640_s6 + $0x8] sm:$0xff] }
 0x281   : > { %v1785_v53 = vpack.c.bf16 %v1420_v22, %v1419_v31 }
 0x282   : > { %1756 = vmatprep.mubr.msk.f32.mxu1 %vm842_vm5, %v1051_v49 }
 0x283   : > { %v1910_v17 = vpop.eup %1909  ;;  %1757 = vmatmul.mubr.msk.f32.gmra.mrb[10].mxu1 %vm842_vm5, %v1052_v50 }
 0x284   : > { %v1054_v13 = vmul.f32 %v1910_v17, %v2513_v59  ;;  %v1055_v51 = vmul.f32 %v1910_v17, %v2515_v61  ;;  %1786 = vmatpush3.bf16.msra.mxu1 %v1785_v53 }
 0x285   : > { %1787 = vmatprep.subr.bf16.mxu1 %v1979_v28 }
 0x286   : > { %1759 = vmatprep.mubr.msk.f32.mxu1 %vm842_vm5, %v1054_v13 }
 0x287   : > { %1760 = vmatmul.mubr.msk.f32.gmra.mrb[12].mxu1 %vm842_vm5, %v1055_v51 }
 0x288   : > { %v1912_v52 = vpop.eup %1911  ;;  %1789 = vmatpush3.bf16.msra.mxu1 %v1788_v35 }
 0x289   : > { %v1057_v23 = vmul.f32 %v1912_v52, %v1896_v11  ;;  %v1058_v19 = vmul.f32 %v1912_v52, %v1898_v12 }
 0x28b   : > { %1762 = vmatprep.mubr.msk.f32.mxu1 %vm842_vm5, %v1057_v23 }
 0x28c   : > { %1763 = vmatmul.mubr.msk.f32.gmra.mrb[14].mxu1 %vm842_vm5, %v1058_v19 }
 0x28d   : > { %1773 = vmatprep.mubr.msk.f32.mxu1 %vm1980_vm6, %v1977_v25 }
 0x29e   : > { %v1286_v59 = vpop.permute.xlu1 %1285 }
 0x29f   : > { %v1284_v61 = vpop.permute.xlu0 %1283 }
 0x2a2   : > { %v1290_v44 = vpop.permute.xlu1 %1289 }
 0x2a6   : > { %v1288_v60 = vpop.permute.xlu1 %1287 }
 0x2a7   : > { %v1292_v63 = vpop.permute.xlu0 %1291 }
 0x2aa   : > { %v1294_v37 = vpop.permute.xlu1 %1293 }
 0x2ab   : > { %v1296_v54 = vpop.permute.xlu0 %1295 }
 0x2ae   : > { %v1298_v11 = vpop.permute.xlu1 %1297 }
 0x2af   : > { %v1300_v41 = vpop.permute.xlu0 %1299 }
 0x2b2   : > { %v1302_v14 = vpop.permute.xlu1 %1301 }
 0x2b5   : > { %v1304_v52 = vpop.permute.xlu0 %1303 }
 0x2b6   : > { %v1306_v3 = vpop.permute.xlu1 %1305 }
 0x341   : > { %v1743_v21 = vpop.f32.mrb[0].mxu1 }
 0x342   : > { %v1332_v10 = vmul.f32 %v1743_v21, %v1286_v59  ;;  %v1188_v24 = vpop.f32.mrb[1].mxu1  ;;  %v1310_v21 = vpop.permute.xlu1 %1309 }
 0x343   : > { %v1331_v2 = vmul.f32 %v1284_v61, %v1188_v24 }
 0x344   : > { %v1348_v4 = vsel %vm350_vm0, %v1332_v10, 0.0 }
 0x345   : > { %v1347_v5 = vsel %vm350_vm0, %v1331_v2, 0.0 }
 0x346   : > { %v1349_v6 = vadd.f32 %v1348_v4, %v1347_v5  ;;  %v1746_v45 = vpop.f32.mrb[2].mxu1 }
 0x347   : > { %v1334_v34 = vmul.f32 %v1746_v45, %v1290_v44  ;;  %v1198_v9 = vpop.f32.mrb[3].mxu1  ;;  %v1308_v45 = vpop.permute.xlu0 %1307 }
 0x348   : > { %v1350_v25 = vrot.slane %v1349_v6, 4  ;;  %v1333_v12 = vmul.f32 %v1288_v60, %v1198_v9 }
 0x349   : > { %v1357_v18 = vsel %vm350_vm0, %v1334_v34, 0.0 }
 0x34a   : > { %v1351_v30 = vadd.f32 %v1350_v25, %v1349_v6  ;;  %v1356_v26 = vsel %vm350_vm0, %v1333_v12, 0.0  ;;  %v1749_v58 = vpop.f32.mrb[4].mxu1 }
 0x34b   : > { %v1358_v15 = vadd.f32 %v1357_v18, %v1356_v26  ;;  %v1336_v16 = vmul.f32 %v1749_v58, %v1294_v37  ;;  %v1208_v27 = vpop.f32.mrb[5].mxu1 }
 0x34c   : > { %v1352_v55 = vrot.slane %v1351_v30, 2  ;;  %v1335_v32 = vmul.f32 %v1292_v63, %v1208_v27 }
 0x34d   : > { %v1359_v62 = vrot.slane %v1358_v15, 4  ;;  %v1366_v47 = vsel %vm350_vm0, %v1336_v16, 0.0 }
 0x34e   : > { %v1353_v33 = vadd.f32 %v1352_v55, %v1351_v30  ;;  %v1365_v20 = vsel %vm350_vm0, %v1335_v32, 0.0  ;;  %v1752_v40 = vpop.f32.mrb[6].mxu1  ;;  %v1314_v55 = vpop.permute.xlu1 %1313 }
 0x34f   : > { %v1360_v42 = vadd.f32 %v1359_v62, %v1358_v15  ;;  %v1367_v39 = vadd.f32 %v1366_v47, %v1365_v20  ;;  %v1338_v1 = vmul.f32 %v1752_v40, %v1298_v11  ;;  %v1218_v43 = vpop.f32.mrb[7].mxu1 }
 0x350   : > { %v1337_v46 = vmul.f32 %v1296_v54, %v1218_v43  ;;  %v1354_v36 = vrot.slane %v1353_v33, 1 }
 0x351   : > { %v1361_v0 = vrot.slane %v1360_v42, 2  ;;  %v1368_v48 = vrot.slane %v1367_v39, 4  ;;  %v1375_v29 = vsel %vm350_vm0, %v1338_v1, 0.0 }
 0x352   : > { %v1374_v7 = vsel %vm350_vm0, %v1337_v46, 0.0  ;;  %v1755_v38 = vpop.f32.mrb[8].mxu1  ;;  %v1355_v28 = vadd.f32 %v1354_v36, %v1353_v33 }
 0x353   : > { %v1362_v8 = vadd.f32 %v1361_v0, %v1360_v42  ;;  %v1369_v49 = vadd.f32 %v1368_v48, %v1367_v39  ;;  %v1376_v50 = vadd.f32 %v1375_v29, %v1374_v7  ;;  %v1340_v17 = vmul.f32 %v1755_v38, %v1302_v14  ;;  %v1228_v13 = vpop.f32.mrb[9].mxu1 }
 0x354   : > { %v1339_v51 = vmul.f32 %v1300_v41, %v1228_v13  ;;  %v1312_v41 = vpop.permute.xlu0 %1311 }
 0x355   : > { %v1363_v23 = vrot.slane %v1362_v8, 1  ;;  %v1370_v19 = vrot.slane %v1369_v49, 2  ;;  %v1377_v31 = vrot.slane %v1376_v50, 4  ;;  %v1384_v22 = vsel %vm350_vm0, %v1340_v17, 0.0 }
 0x356   : > { %v1383_v53 = vsel %vm350_vm0, %v1339_v51, 0.0  ;;  %v1758_v56 = vpop.f32.mrb[10].mxu1 }
 0x357   : > { %v1364_v57 = vadd.f32 %v1363_v23, %v1362_v8  ;;  %v1371_v35 = vadd.f32 %v1370_v19, %v1369_v49  ;;  %v1378_v59 = vadd.f32 %v1377_v31, %v1376_v50  ;;  %v1385_v44 = vadd.f32 %v1384_v22, %v1383_v53  ;;  %v1238_v60 = vpop.f32.mrb[11].mxu1 }
 0x358   : > { %v1342_v61 = vmul.f32 %v1758_v56, %v1306_v3  ;;  %v1341_v37 = vmul.f32 %v1304_v52, %v1238_v60 }
 0x359   : > { %v1439_v10 = vsel %vm1438_vm7, %v1364_v57, %v1355_v28  ;;  %v1372_v24 = vrot.slane %v1371_v35, 1  ;;  %v1379_v63 = vrot.slane %v1378_v59, 2  ;;  %v1386_v2 = vrot.slane %v1385_v44, 4 }
 0x35a   : > { %v1393_v4 = vsel %vm350_vm0, %v1342_v61, 0.0  ;;  %v1392_v5 = vsel %vm350_vm0, %v1341_v37, 0.0  ;;  %v1761_v6 = vpop.f32.mrb[12].mxu1 }
 0x35b   : > { %v1373_v11 = vadd.f32 %v1372_v24, %v1371_v35  ;;  %v1380_v34 = vadd.f32 %v1379_v63, %v1378_v59  ;;  %v1387_v9 = vadd.f32 %v1386_v2, %v1385_v44  ;;  %v1394_v25 = vadd.f32 %v1393_v4, %v1392_v5  ;;  %v1248_v12 = vpop.f32.mrb[13].mxu1  ;;  %v1657_v35 = vld [vmem:[%s2641_s7] ss:$0 sm:$0xff] }
 0x35c   : > { %v1344_v54 = vmul.f32 %v1761_v6, %v1310_v21  ;;  %v1343_v18 = vmul.f32 %v1308_v45, %v1248_v12 }
 0x35d   : > { %v1441_v30 = vsel %vm1440_vm8, %v1373_v11, %v1439_v10  ;;  %v1381_v26 = vrot.slane %v1380_v34, 1  ;;  %v1388_v58 = vrot.slane %v1387_v9, 2  ;;  %v1395_v15 = vrot.slane %v1394_v25, 4 }
 0x35e   : > { %v1402_v16 = vsel %vm350_vm0, %v1344_v54, 0.0  ;;  %v1401_v27 = vsel %vm350_vm0, %v1343_v18, 0.0 }
 0x35f   : > { %v1382_v32 = vadd.f32 %v1381_v26, %v1380_v34  ;;  %v1389_v14 = vadd.f32 %v1388_v58, %v1387_v9  ;;  %v1396_v62 = vadd.f32 %v1395_v15, %v1394_v25  ;;  %v1403_v47 = vadd.f32 %v1402_v16, %v1401_v27  ;;  %v1764_v33 = vpop.f32.mrb[14].mxu1 }
 0x360   : > { %v1346_v20 = vmul.f32 %v1764_v33, %v1314_v55  ;;  %v1258_v40 = vpop.f32.mrb[15].mxu1 }
 0x361   : > { %v1443_v42 = vsel %vm1442_vm9, %v1382_v32, %v1441_v30  ;;  %v1390_v39 = vrot.slane %v1389_v14, 1  ;;  %v1397_v1 = vrot.slane %v1396_v62, 2  ;;  %v1404_v43 = vrot.slane %v1403_v47, 4 }
 0x362   : > { %v1411_v46 = vsel %vm350_vm0, %v1346_v20, 0.0  ;;  %v1345_v0 = vmul.f32 %v1312_v41, %v1258_v40 }
 0x363   : > { %v1391_v48 = vadd.f32 %v1390_v39, %v1389_v14  ;;  %v1398_v29 = vadd.f32 %v1397_v1, %v1396_v62  ;;  %v1405_v36 = vadd.f32 %v1404_v43, %v1403_v47 }
 0x364   : > { %v1410_v7 = vsel %vm350_vm0, %v1345_v0, 0.0 }
 0x365   : > { %v1445_v38 = vsel %vm1444_vm10, %v1391_v48, %v1443_v42  ;;  %v1399_v3 = vrot.slane %v1398_v29, 1  ;;  %v1406_v8 = vrot.slane %v1405_v36, 2  ;;  %v1412_v49 = vadd.f32 %v1411_v46, %v1410_v7 }
 0x367   : > { %v1400_v50 = vadd.f32 %v1399_v3, %v1398_v29  ;;  %v1407_v17 = vadd.f32 %v1406_v8, %v1405_v36  ;;  %v1413_v13 = vrot.slane %v1412_v49, 4 }
 0x369   : > { %v1408_v51 = vrot.slane %v1407_v17, 1  ;;  %v1414_v52 = vadd.f32 %v1413_v13, %v1412_v49  ;;  %v1447_v23 = vsel %vm1446_vm11, %v1400_v50, %v1445_v38 }
 0x36b   : > { %v1409_v19 = vadd.f32 %v1408_v51, %v1407_v17  ;;  %v1415_v31 = vrot.slane %v1414_v52, 2 }
 0x36d   : > { %v1416_v22 = vadd.f32 %v1415_v31, %v1414_v52  ;;  %v1449_v28 = vsel %vm1448_vm12, %v1409_v19, %v1447_v23 }
 0x36f   : > { %v1417_v53 = vrot.slane %v1416_v22, 1 }
 0x371   : > { %v1418_v56 = vadd.f32 %v1417_v53, %v1416_v22 }
 0x373   : > { %v1451_v57 = vsel %vm1450_vm13, %v1418_v56, %v1449_v28 }
 0x374   : > { %1774 = vmatmul.mubr.msk.f32.vlgmr.msra.gmra.mrb[16].mxu1 %vm350_vm0, %v1451_v57 }
 0x447   : > { %v1520_v59 = vpop.f32.mrb[16].mxu1 }
 0x448   : > { %v1521_v44 = vadd.f32 %v1657_v35, %v1520_v59  ;;  %v1775_v60 = vpop.f32.mrb[17].mxu1 }
 0x44a   : > { %1524 = vst.msk [vmem:[%s319_s18] sm:$0xff] %vm350_vm0, %v1521_v44 }
 0x44b   : > { %1926 = shalt.err (!%p1923_p3)
}
 0x44c   : > { %s1927_s24 = scalar_lea.hbm %s2591_s20, 128  ;;  %s1931_s17 = scalar_lea.hbm %s2642_s8, 256 }
 0x44d   : > { %p1928_p4 = scmp.ne.s32.totalorder %s2591_s20, %s1927_s24  ;;  %p1932_p9 = scmp.lt.u32.totalorder %s2591_s20, %s2642_s8 }
 0x44e   : > { %p1933_p10 = scmp.lt.u32.totalorder %s1931_s17, %s1927_s24  ;;  %p1935_p12 = scmp.lt.u32.totalorder %s1927_s24, %s2591_s20 }
 0x44f   : > { %p1929_p7 = pnand %p1928_p4, %p2065_p5 }
 0x450   : > { %p1934_p11 = por %p1933_p10, %p1932_p9 }
 0x451   : > { %p1930_p8 = pneg %p1929_p7 }
 0x452   : > { %p1936_p13 = por %p1935_p12, %p1934_p11 }
 0x454   : > { %p1937_p0 = pnand %p1936_p13, %p1930_p8 }
 0x456   : > { %1940 = shalt.err (!%p1937_p0)
}
 0x457   : > { %1790 = dma.vmem_to_hbm [thread:$0]  (%p2065_p5), %s2593_s12, 128, %s2591_s20, %s1526_s21  }
 0x458 PF: > { %p1796_p1 = scmp.ge.s32.totalorder %s1975_s30, 2  ;;  %s1551_s19 = sand.u32 1, %s1963_s27  }
 0x459   : > { %s1552_s22 = scalar_lea.sflag [#allocation3], %s1551_s19 }
 0x45a   : > { %p1793_p2 = pnand %p1796_p1, %p2069_p6 }
 0x45c   : > { %1958 = dma.done.wait (!%p1793_p2), %s1552_s22, 128  }
 0x45d   : > { %1960 = vsyncadd (!%p1793_p2), %s1552_s22, 4294967168  ;;  %p18_p3 = scmp.ge.s32.totalorder %s2052_s11, 4   ;;  %s2645_s27 = smov %s1967_s28 }
 0x45e   : > { %s2646_s28 = smov %s1971_s29  ;;  %s2647_s29 = smov %s2063_s14 }
 0x45f   : > { %s2648_s30 = smov %s2052_s11  ;;  %20 = sbr.rel (!%p18_p3) target bundleno = 3 (0x3), region = 90 }
 0x466   :  { %1557 = vsyncpa [#allocation3], 1 }
 0x467   :  { %1559 = vsyncpa [#allocation3 + $0x1], 1 }

</bundles_post_ra>
